<compile_context>
chip_gen: v5e
topology: v5e:2x2
jax: 0.10.0
libtpu: 0.0.40
codegen_flags: <defaults>
</compile_context>

<pallas_src>
import math
import functools

import jax
import jax.numpy as jnp
from jax.experimental import pallas as pl
from jax.experimental.pallas import tpu as pltpu


def _vmem_limit_bytes():
    cap = 128 * 1024 * 1024
    try:
        info = pltpu.get_tpu_info()
        cap = int(getattr(info, "vmem_capacity_bytes", cap))
    except Exception:
        pass
    # ~96 MiB on v5e/v6e (128 MiB VMEM), ~48 MiB on v7x (64 MiB/TC).
    return max(32 * 1024 * 1024, min(cap * 3 // 4, 100 * 1024 * 1024))


def _pick_tile(n, cap):
    for t in (2048, 1024, 512, 256, 128, 64, 32, 16, 8):
        if t <= cap and n % t == 0:
            return t
    return n


def _rmsnorm(v, eps=1e-6):
    ms = jnp.mean(v * v, axis=-1, keepdims=True)
    return v * jax.lax.rsqrt(ms + eps)


# ------- kernel 1: rmsnorm -> QKV GEMM -> vectorized rotary, lane-dense out -------
def _qkv_rope_kernel(x_ref, cos_ref, sin_ref, wqkv_ref, q_ref, k_ref, v_ref,
                     *, n_head, C, D, d2, q_scale):
    x = x_ref[0]                                                  # (TT, C) f32
    h = _rmsnorm(x).astype(jnp.bfloat16)
    # One wide GEMM (C -> 3C): bf16 operands, f32 accumulation.
    qkv = jnp.dot(h, wqkv_ref[...], preferred_element_type=jnp.float32)   # (TT, 3C)

    # Full-width rotary over q AND k at once (no per-head math / stores):
    # within every D-wide head segment the rotation partner of x1 is x2 and
    # vice versa, so build the partner once for all 2H segments and do two
    # full-width FMAs.
    qk = qkv[:, :2 * C]                                           # (TT, 2C)
    parts = []
    for g in range(2 * n_head):
        seg = qk[:, g * D:(g + 1) * D]
        parts.append(seg[:, d2:])                                 # x2
        parts.append(seg[:, :d2])                                 # x1
    qk_part = jnp.concatenate(parts, axis=1)                      # (TT, 2C)

    cos_c = jnp.concatenate([cos_ref[...]] * (2 * n_head), axis=1)  # [cos|cos] per seg
    sin_c = jnp.concatenate([sin_ref[...]] * (2 * n_head), axis=1)  # [sin|-sin] per seg
    qk_rot = qk * cos_c + qk_part * sin_c                         # (TT, 2C) f32

    # Lane-dense (TT, C) bf16 stores; softmax scale 1/sqrt(D) folded into q.
    q_ref[0] = (qk_rot[:, :C] * q_scale).astype(q_ref.dtype)
    k_ref[0] = qk_rot[:, C:].astype(k_ref.dtype)
    v_ref[0] = qkv[:, 2 * C:].astype(v_ref.dtype)


# ------- kernel 2: causal flash attention (lower-triangular flat grid) -------
#         + single full-width output projection + residual
def _attn_kernel(qt_ref, kt_ref, x_ref, q_ref, k_ref, v_ref, wp_ref, o_ref,
                 m_sc, l_sc, acc_sc, *, n_head, D):
    p = pl.program_id(1)
    qt = qt_ref[p]
    kt = kt_ref[p]

    @pl.when(kt == 0)                       # first kv step of this q-tile run
    def _init():
        m_sc[...] = jnp.full(m_sc.shape, -jnp.inf, m_sc.dtype)
        l_sc[...] = jnp.zeros(l_sc.shape, l_sc.dtype)
        acc_sc[...] = jnp.zeros(acc_sc.shape, acc_sc.dtype)

    q = q_ref[0]                            # (TQ, C) bf16 (pre-scaled)
    k = k_ref[0]                            # (TK, C) bf16
    v = v_ref[0]                            # (TK, C) bf16

    def flash_step(masked):
        for h in range(n_head):
            lo, hi = h * D, (h + 1) * D
            s = jax.lax.dot_general(q[:, lo:hi], k[:, lo:hi],
                                    (((1,), (1,)), ((), ())),
                                    preferred_element_type=jnp.float32)
            if masked:                      # diagonal tile only (TQ == TK)
                row = jax.lax.broadcasted_iota(jnp.int32, s.shape, 0)
                col = jax.lax.broadcasted_iota(jnp.int32, s.shape, 1)
                s = jnp.where(row >= col, s, -1e30)
            m_prev = m_sc[h]
            m_new = jnp.maximum(m_prev, jnp.max(s, axis=-1, keepdims=True))
            alpha = jnp.exp(m_prev - m_new)
            pmat = jnp.exp(s - m_new)
            l_sc[h] = alpha * l_sc[h] + jnp.sum(pmat, axis=-1, keepdims=True)
            acc_sc[:, lo:hi] = alpha * acc_sc[:, lo:hi] + jnp.dot(
                pmat.astype(jnp.bfloat16), v[:, lo:hi],
                preferred_element_type=jnp.float32)
            m_sc[h] = m_new

    @pl.when(kt < qt)                       # off-diagonal tiles: fully unmasked
    def _off_diag():
        flash_step(masked=False)

    # Diagonal tile is the LAST grid step for this q-tile (pairs are ordered
    # kt=0..qt per qt), and the output block index is constant over the whole
    # run, so finalizing + writing here is safe.
    @pl.when(kt == qt)
    def _diag_and_finalize():
        flash_step(masked=True)
        inv_l = pl.reciprocal(l_sc[...], approx=True)             # (H, TQ, 1)
        y = jnp.concatenate(
            [acc_sc[:, h * D:(h + 1) * D] * inv_l[h] for h in range(n_head)],
            axis=1).astype(jnp.bfloat16)                          # (TQ, C)
        # One (TQ, C) @ (C, C) projection; mixer_scale folded into wp host-side.
        o_ref[0] = x_ref[0] + jnp.dot(y, wp_ref[...],
                                      preferred_element_type=jnp.float32)


# ------- kernel 3: rmsnorm -> MLP (exact GELU), hidden dim tiled, + residual -------
def _mlp_kernel(x1_ref, wfc_ref, wmlp_ref, o_ref, hn_sc, acc_sc):
    f = pl.program_id(2)

    @pl.when(f == 0)
    def _init():
        hn_sc[...] = _rmsnorm(x1_ref[0]).astype(jnp.bfloat16)     # cache normed x1
        acc_sc[...] = jnp.zeros(acc_sc.shape, acc_sc.dtype)

    u = jnp.dot(hn_sc[...], wfc_ref[...], preferred_element_type=jnp.float32)
    g = 0.5 * u * (1.0 + jax.lax.erf(u * (1.0 / math.sqrt(2.0))))  # exact GELU (f32)
    acc_sc[...] += jnp.dot(g.astype(jnp.bfloat16), wmlp_ref[...],
                           preferred_element_type=jnp.float32)

    @pl.when(f == pl.num_programs(2) - 1)
    def _fin():
        o_ref[0] = x1_ref[0] + acc_sc[...]


def block_forward(x, cos, sin, w_qkv, w_attn_proj, w_fc, w_mlp_proj,
                  n_head, mixer_scale):
    """x: (B, T, C) float32. Weights are PyTorch nn.Linear weights (out, in)."""
    B, T, C = x.shape
    assert C % n_head == 0
    D = C // n_head
    assert D % 2 == 0
    d2 = D // 2
    F = 4 * C

    x = x.astype(jnp.float32)
    vmem = _vmem_limit_bytes()

    TT = _pick_tile(T, 512)      # T-tile for the GEMM-heavy kernels 1 & 3
    TA = _pick_tile(T, 256)      # attention q/kv tile
    FT = _pick_tile(F, 1024)     # MLP hidden-dim tile
    NT = T // TT
    NA = T // TA
    NF = F // FT

    # Weight glue: pre-transpose so kernels compute x @ W; cast to bf16 so the
    # MXU runs at bf16 throughput (accumulation stays f32 inside the kernels).
    # TODO(synk): on v7x at large C, also mark these grid-invariant weight specs
    # pipeline_mode=pl.Buffered(1) to avoid double-buffering them.
    wqkv_t = w_qkv.T.astype(jnp.bfloat16)                           # (C, 3C)
    wproj_t = (mixer_scale * w_attn_proj.T).astype(jnp.bfloat16)    # (C, C), scale folded
    wfc_t = w_fc.T.astype(jnp.bfloat16)                             # (C, 4C)
    wmlp_t = w_mlp_proj.T.astype(jnp.bfloat16)                      # (4C, C)

    # Rotary tables arranged for vectorized rotate-half: [cos|cos], [sin|-sin].
    cos_d = jnp.concatenate([cos, cos], axis=1).astype(jnp.float32)   # (T, D)
    sin_d = jnp.concatenate([sin, -sin], axis=1).astype(jnp.float32)  # (T, D)

    # ---- 1) rmsnorm -> QKV -> rotary; q/k/v stored lane-dense (B, T, C) bf16 ----
    qkv_kernel = functools.partial(_qkv_rope_kernel, n_head=n_head, C=C, D=D,
                                   d2=d2, q_scale=1.0 / math.sqrt(D))
    q, k, v = pl.pallas_call(
        qkv_kernel,
        out_shape=tuple(jax.ShapeDtypeStruct((B, T, C), jnp.bfloat16)
                        for _ in range(3)),
        grid=(B, NT),
        in_specs=[
            pl.BlockSpec((1, TT, C), lambda b, t: (b, t, 0)),      # x
            pl.BlockSpec((TT, D), lambda b, t: (t, 0)),            # cos table
            pl.BlockSpec((TT, D), lambda b, t: (t, 0)),            # sin table
            pl.BlockSpec((C, 3 * C), lambda b, t: (0, 0)),         # Wqkv^T (bf16)
        ],
        out_specs=tuple(pl.BlockSpec((1, TT, C), lambda b, t: (b, t, 0))
                        for _ in range(3)),
        compiler_params=pltpu.CompilerParams(
            dimension_semantics=("parallel", "parallel"),
            vmem_limit_bytes=vmem),
        cost_estimate=pl.CostEstimate(
            flops=2 * B * T * C * 3 * C + 8 * B * T * C,
            transcendentals=B * T,
            bytes_accessed=B * T * C * 4 + 3 * C * C * 2 + 3 * B * T * C * 2),
    )(x, cos_d, sin_d, wqkv_t)

    # ---- 2) causal flash attention over the lower-triangular pair grid ----
    pairs = [(qt, kt) for qt in range(NA) for kt in range(qt + 1)]
    qt_ids = jnp.asarray([p_[0] for p_ in pairs], dtype=jnp.int32)
    kt_ids = jnp.asarray([p_[1] for p_ in pairs], dtype=jnp.int32)
    P = len(pairs)

    attn_kernel = functools.partial(_attn_kernel, n_head=n_head, D=D)
    x1 = pl.pallas_call(
        attn_kernel,
        out_shape=jax.ShapeDtypeStruct((B, T, C), jnp.float32),
        grid_spec=pltpu.PrefetchScalarGridSpec(
            num_scalar_prefetch=2,
            grid=(B, P),
            in_specs=[
                pl.BlockSpec((1, TA, C), lambda b, p, qt, kt: (b, qt[p], 0)),  # x (residual)
                pl.BlockSpec((1, TA, C), lambda b, p, qt, kt: (b, qt[p], 0)),  # q
                pl.BlockSpec((1, TA, C), lambda b, p, qt, kt: (b, kt[p], 0)),  # k
                pl.BlockSpec((1, TA, C), lambda b, p, qt, kt: (b, kt[p], 0)),  # v
                pl.BlockSpec((C, C), lambda b, p, qt, kt: (0, 0)),             # Wproj (scaled)
            ],
            out_specs=pl.BlockSpec((1, TA, C), lambda b, p, qt, kt: (b, qt[p], 0)),
            scratch_shapes=[
                pltpu.VMEM((n_head, TA, 1), jnp.float32),   # running max m (per head)
                pltpu.VMEM((n_head, TA, 1), jnp.float32),   # running denom l (per head)
                pltpu.VMEM((TA, C), jnp.float32),           # un-normalized acc, all heads
            ]),
        compiler_params=pltpu.CompilerParams(
            dimension_semantics=("parallel", "arbitrary"),
            vmem_limit_bytes=vmem),
        cost_estimate=pl.CostEstimate(
            flops=2 * B * n_head * T * T * D + 2 * B * T * C * C,
            transcendentals=B * n_head * T * T,
            bytes_accessed=B * T * C * 14 + C * C * 2),
    )(qt_ids, kt_ids, x, q, k, v, wproj_t)

    # ---- 3) rmsnorm -> MLP (exact GELU) + residual, hidden dim tiled ----
    out = pl.pallas_call(
        _mlp_kernel,
        out_shape=jax.ShapeDtypeStruct((B, T, C), jnp.float32),
        grid=(B, NT, NF),
        in_specs=[
            pl.BlockSpec((1, TT, C), lambda b, t, f: (b, t, 0)),   # x1
            pl.BlockSpec((C, FT), lambda b, t, f: (0, f)),         # Wfc^T slice
            pl.BlockSpec((FT, C), lambda b, t, f: (f, 0)),         # Wmlp^T slice
        ],
        out_specs=pl.BlockSpec((1, TT, C), lambda b, t, f: (b, t, 0)),
        scratch_shapes=[
            pltpu.VMEM((TT, C), jnp.bfloat16),   # cached rmsnorm(x1)
            pltpu.VMEM((TT, C), jnp.float32),    # output accumulator
        ],
        compiler_params=pltpu.CompilerParams(
            dimension_semantics=("parallel", "parallel", "arbitrary"),
            vmem_limit_bytes=vmem),
        cost_estimate=pl.CostEstimate(
            flops=4 * B * T * C * 4 * C,
            transcendentals=B * T * 4 * C,
            bytes_accessed=B * T * C * 8 + 8 * C * C * 2),
    )(x1, wfc_t, wmlp_t)
    return out


# ---------------- pure-JAX f32 reference (for sanity check) ----------------
def _ref_block(x, cos, sin, w_qkv, w_attn_proj, w_fc, w_mlp_proj, n_head, mixer_scale):
    B, T, C = x.shape
    D = C // n_head
    d2 = D // 2

    def rms(v):
        return v * jax.lax.rsqrt(jnp.mean(v * v, -1, keepdims=True) + 1e-6)

    h = rms(x)
    qkv = h @ w_qkv.T
    q, k, v = jnp.split(qkv, 3, axis=-1)
    q = q.reshape(B, T, n_head, D)
    k = k.reshape(B, T, n_head, D)
    v = v.reshape(B, T, n_head, D)

    c = cos[None, :, None, :]
    s = sin[None, :, None, :]

    def rope(u):
        u1, u2 = u[..., :d2], u[..., d2:]
        return jnp.concatenate([u1 * c + u2 * s, -u1 * s + u2 * c], axis=-1)

    q, k = rope(q), rope(k)
    qh = q.transpose(0, 2, 1, 3)
    kh = k.transpose(0, 2, 1, 3)
    vh = v.transpose(0, 2, 1, 3)
    scores = jnp.einsum('bhtd,bhsd->bhts', qh, kh) / math.sqrt(D)
    mask = jnp.tril(jnp.ones((T, T), dtype=bool))
    scores = jnp.where(mask, scores, -1e30)
    p = jax.nn.softmax(scores, axis=-1)
    y = jnp.einsum('bhts,bhsd->bhtd', p, vh).transpose(0, 2, 1, 3).reshape(B, T, C)
    x1 = x + mixer_scale * (y @ w_attn_proj.T)

    h2 = rms(x1)
    u = h2 @ w_fc.T
    g = 0.5 * u * (1.0 + jax.lax.erf(u / math.sqrt(2.0)))
    return x1 + g @ w_mlp_proj.T


if __name__ == "__main__":
    # Small config: n_embd=32, n_head=4 (head_dim=8), n_layer=2, bias=False
    B, T, C = 2, 8, 32
    n_head = 4
    n_layer = 2
    head_dim = C // n_head
    mixer_scale = 1.0 / math.sqrt(2 * n_layer)

    key = jax.random.PRNGKey(0)
    kx, k1, k2, k3, k4 = jax.random.split(key, 5)
    x = jax.random.normal(kx, (B, T, C), dtype=jnp.float32)
    w_qkv = 0.02 * jax.random.normal(k1, (3 * C, C), dtype=jnp.float32)
    w_attn_proj = 0.02 * jax.random.normal(k2, (C, C), dtype=jnp.float32)
    w_fc = 0.02 * jax.random.normal(k3, (4 * C, C), dtype=jnp.float32)
    w_mlp_proj = 0.02 * jax.random.normal(k4, (C, 4 * C), dtype=jnp.float32)

    # Rotary cos/sin tables (as in Rotary.forward, base=10000)
    inv_freq = 1.0 / (10000.0 ** (jnp.arange(0, head_dim, 2, dtype=jnp.float32) / head_dim))
    t = jnp.arange(T, dtype=jnp.float32)
    freqs = jnp.outer(t, inv_freq)          # (T, head_dim//2)
    cos = jnp.cos(freqs)
    sin = jnp.sin(freqs)

    out = block_forward(x, cos, sin, w_qkv, w_attn_proj, w_fc, w_mlp_proj,
                        n_head, mixer_scale)
    out = jax.block_until_ready(out)

    ref = _ref_block(x, cos, sin, w_qkv, w_attn_proj, w_fc, w_mlp_proj,
                     n_head, mixer_scale)
    assert out.shape == (B, T, C)
    # bf16 MXU operands (f32 accumulation) + approx reciprocal vs pure-f32 reference.
    assert jnp.allclose(out, ref, atol=2e-2, rtol=2e-2), "mismatch vs reference"
    print("KERNEL_OK")
</pallas_src>

<mosaic_0001>
module attributes {stable_mosaic.version = 11 : i64} {
  func.func @_qkv_rope_kernel(%arg0: i32, %arg1: i32, %arg2: memref<1x8x32xf32, #tpu.memory_space<vmem>>, %arg3: memref<8x8xf32, #tpu.memory_space<vmem>>, %arg4: memref<8x8xf32, #tpu.memory_space<vmem>>, %arg5: memref<32x96xbf16, #tpu.memory_space<vmem>>, %arg6: memref<1x8x32xbf16, #tpu.memory_space<vmem>>, %arg7: memref<1x8x32xbf16, #tpu.memory_space<vmem>>, %arg8: memref<1x8x32xbf16, #tpu.memory_space<vmem>>) attributes {dimension_semantics = [#tpu.dimension_semantics<parallel>, #tpu.dimension_semantics<parallel>], iteration_bounds = array<i64: 2, 1>, scalar_prefetch = 0 : i64, scratch_operands = 0 : i64, tpu.core_type = #tpu.core_type<tc>, window_params = [{transform_indices = @transform_0, window_bounds = array<i64: 1, 8, 32>}, {transform_indices = @transform_1, window_bounds = array<i64: 8, 8>}, {transform_indices = @transform_2, window_bounds = array<i64: 8, 8>}, {pipeline_mode = #tpu.pipeline_mode<synchronous>, transform_indices = @transform_3, window_bounds = array<i64: 32, 96>}, {transform_indices = @transform_4, window_bounds = array<i64: 1, 8, 32>}, {transform_indices = @transform_5, window_bounds = array<i64: 1, 8, 32>}, {transform_indices = @transform_6, window_bounds = array<i64: 1, 8, 32>}]} {
    %c0 = arith.constant 0 : index
    %c0_0 = arith.constant 0 : index
    %c0_1 = arith.constant 0 : index
    %0 = vector.load %arg2[%c0, %c0_0, %c0_1] : memref<1x8x32xf32, #tpu.memory_space<vmem>>, vector<1x8x32xf32>
    %1 = vector.shape_cast %0 : vector<1x8x32xf32> to vector<8x32xf32>
    %2 = arith.mulf %1, %1 : vector<8x32xf32>
    %cst = arith.constant dense<0.000000e+00> : vector<8xf32>
    %3 = vector.multi_reduction <add>, %2, %cst [1] : vector<8x32xf32> to vector<8xf32>
    %4 = vector.shape_cast %3 : vector<8xf32> to vector<8x1xf32>
    %cst_2 = arith.constant 3.200000e+01 : f32
    %5 = vector.broadcast %cst_2 : f32 to vector<8x1xf32>
    %6 = arith.divf %4, %5 : vector<8x1xf32>
    %cst_3 = arith.constant 9.99999997E-7 : f32
    %7 = vector.broadcast %cst_3 : f32 to vector<8x1xf32>
    %8 = arith.addf %6, %7 : vector<8x1xf32>
    %9 = math.rsqrt %8 : vector<8x1xf32>
    %10 = vector.broadcast %9 : vector<8x1xf32> to vector<8x32xf32>
    %11 = arith.mulf %1, %10 : vector<8x32xf32>
    %12 = arith.truncf %11 : vector<8x32xf32> to vector<8x32xbf16>
    %c0_4 = arith.constant 0 : index
    %c0_5 = arith.constant 0 : index
    %13 = vector.load %arg5[%c0_4, %c0_5] : memref<32x96xbf16, #tpu.memory_space<vmem>>, vector<32x96xbf16>
    %cst_6 = arith.constant dense<0.000000e+00> : vector<8x96xf32>
    %14 = tpu.matmul %12, %13, %cst_6 {dimension_numbers = #tpu.dot_dimension_numbers<[1], [0], [0], [1], [0, 0, 1, 1], [], []>} : vector<8x32xbf16>, vector<32x96xbf16>, vector<8x96xf32> -> vector<8x96xf32>
    %15 = vector.extract_strided_slice %14 {offsets = [0, 0], sizes = [8, 64], strides = [1, 1]} : vector<8x96xf32> to vector<8x64xf32>
    %16 = vector.extract_strided_slice %15 {offsets = [0, 0], sizes = [8, 8], strides = [1, 1]} : vector<8x64xf32> to vector<8x8xf32>
    %17 = vector.extract_strided_slice %16 {offsets = [0, 4], sizes = [8, 4], strides = [1, 1]} : vector<8x8xf32> to vector<8x4xf32>
    %18 = vector.extract_strided_slice %16 {offsets = [0, 0], sizes = [8, 4], strides = [1, 1]} : vector<8x8xf32> to vector<8x4xf32>
    %19 = vector.extract_strided_slice %15 {offsets = [0, 8], sizes = [8, 8], strides = [1, 1]} : vector<8x64xf32> to vector<8x8xf32>
    %20 = vector.extract_strided_slice %19 {offsets = [0, 4], sizes = [8, 4], strides = [1, 1]} : vector<8x8xf32> to vector<8x4xf32>
    %21 = vector.extract_strided_slice %19 {offsets = [0, 0], sizes = [8, 4], strides = [1, 1]} : vector<8x8xf32> to vector<8x4xf32>
    %22 = vector.extract_strided_slice %15 {offsets = [0, 16], sizes = [8, 8], strides = [1, 1]} : vector<8x64xf32> to vector<8x8xf32>
    %23 = vector.extract_strided_slice %22 {offsets = [0, 4], sizes = [8, 4], strides = [1, 1]} : vector<8x8xf32> to vector<8x4xf32>
    %24 = vector.extract_strided_slice %22 {offsets = [0, 0], sizes = [8, 4], strides = [1, 1]} : vector<8x8xf32> to vector<8x4xf32>
    %25 = vector.extract_strided_slice %15 {offsets = [0, 24], sizes = [8, 8], strides = [1, 1]} : vector<8x64xf32> to vector<8x8xf32>
    %26 = vector.extract_strided_slice %25 {offsets = [0, 4], sizes = [8, 4], strides = [1, 1]} : vector<8x8xf32> to vector<8x4xf32>
    %27 = vector.extract_strided_slice %25 {offsets = [0, 0], sizes = [8, 4], strides = [1, 1]} : vector<8x8xf32> to vector<8x4xf32>
    %28 = vector.extract_strided_slice %15 {offsets = [0, 32], sizes = [8, 8], strides = [1, 1]} : vector<8x64xf32> to vector<8x8xf32>
    %29 = vector.extract_strided_slice %28 {offsets = [0, 4], sizes = [8, 4], strides = [1, 1]} : vector<8x8xf32> to vector<8x4xf32>
    %30 = vector.extract_strided_slice %28 {offsets = [0, 0], sizes = [8, 4], strides = [1, 1]} : vector<8x8xf32> to vector<8x4xf32>
    %31 = vector.extract_strided_slice %15 {offsets = [0, 40], sizes = [8, 8], strides = [1, 1]} : vector<8x64xf32> to vector<8x8xf32>
    %32 = vector.extract_strided_slice %31 {offsets = [0, 4], sizes = [8, 4], strides = [1, 1]} : vector<8x8xf32> to vector<8x4xf32>
    %33 = vector.extract_strided_slice %31 {offsets = [0, 0], sizes = [8, 4], strides = [1, 1]} : vector<8x8xf32> to vector<8x4xf32>
    %34 = vector.extract_strided_slice %15 {offsets = [0, 48], sizes = [8, 8], strides = [1, 1]} : vector<8x64xf32> to vector<8x8xf32>
    %35 = vector.extract_strided_slice %34 {offsets = [0, 4], sizes = [8, 4], strides = [1, 1]} : vector<8x8xf32> to vector<8x4xf32>
    %36 = vector.extract_strided_slice %34 {offsets = [0, 0], sizes = [8, 4], strides = [1, 1]} : vector<8x8xf32> to vector<8x4xf32>
    %37 = vector.extract_strided_slice %15 {offsets = [0, 56], sizes = [8, 8], strides = [1, 1]} : vector<8x64xf32> to vector<8x8xf32>
    %38 = vector.extract_strided_slice %37 {offsets = [0, 4], sizes = [8, 4], strides = [1, 1]} : vector<8x8xf32> to vector<8x4xf32>
    %39 = vector.extract_strided_slice %37 {offsets = [0, 0], sizes = [8, 4], strides = [1, 1]} : vector<8x8xf32> to vector<8x4xf32>
    %40 = tpu.concatenate %17, %18, %20, %21, %23, %24, %26, %27, %29, %30, %32, %33, %35, %36, %38, %39 in 1 : vector<8x4xf32>, vector<8x4xf32>, vector<8x4xf32>, vector<8x4xf32>, vector<8x4xf32>, vector<8x4xf32>, vector<8x4xf32>, vector<8x4xf32>, vector<8x4xf32>, vector<8x4xf32>, vector<8x4xf32>, vector<8x4xf32>, vector<8x4xf32>, vector<8x4xf32>, vector<8x4xf32>, vector<8x4xf32> -> vector<8x64xf32>
    %c0_7 = arith.constant 0 : index
    %c0_8 = arith.constant 0 : index
    %41 = vector.load %arg3[%c0_7, %c0_8] : memref<8x8xf32, #tpu.memory_space<vmem>>, vector<8x8xf32>
    %42 = tpu.concatenate %41, %41, %41, %41, %41, %41, %41, %41 in 1 : vector<8x8xf32>, vector<8x8xf32>, vector<8x8xf32>, vector<8x8xf32>, vector<8x8xf32>, vector<8x8xf32>, vector<8x8xf32>, vector<8x8xf32> -> vector<8x64xf32>
    %c0_9 = arith.constant 0 : index
    %c0_10 = arith.constant 0 : index
    %43 = vector.load %arg4[%c0_9, %c0_10] : memref<8x8xf32, #tpu.memory_space<vmem>>, vector<8x8xf32>
    %44 = tpu.concatenate %43, %43, %43, %43, %43, %43, %43, %43 in 1 : vector<8x8xf32>, vector<8x8xf32>, vector<8x8xf32>, vector<8x8xf32>, vector<8x8xf32>, vector<8x8xf32>, vector<8x8xf32>, vector<8x8xf32> -> vector<8x64xf32>
    %45 = arith.mulf %15, %42 : vector<8x64xf32>
    %46 = arith.mulf %40, %44 : vector<8x64xf32>
    %47 = arith.addf %45, %46 : vector<8x64xf32>
    %48 = vector.extract_strided_slice %47 {offsets = [0, 0], sizes = [8, 32], strides = [1, 1]} : vector<8x64xf32> to vector<8x32xf32>
    %cst_11 = arith.constant 0.353553385 : f32
    %49 = vector.broadcast %cst_11 : f32 to vector<8x32xf32>
    %50 = arith.mulf %48, %49 : vector<8x32xf32>
    %51 = arith.truncf %50 : vector<8x32xf32> to vector<8x32xbf16>
    %c0_12 = arith.constant 0 : index
    %c0_13 = arith.constant 0 : index
    %c0_14 = arith.constant 0 : index
    %52 = vector.load %arg6[%c0_12, %c0_13, %c0_14] : memref<1x8x32xbf16, #tpu.memory_space<vmem>>, vector<1x8x32xbf16>
    %53 = vector.shape_cast %52 : vector<1x8x32xbf16> to vector<8x32xbf16>
    %54 = vector.shape_cast %51 : vector<8x32xbf16> to vector<1x8x32xbf16>
    tpu.vector_store %arg6[%c0_12, %c0_13, %c0_14], %54 {strides = array<i32>} : memref<1x8x32xbf16, #tpu.memory_space<vmem>>, vector<1x8x32xbf16>,
    %55 = vector.extract_strided_slice %47 {offsets = [0, 32], sizes = [8, 32], strides = [1, 1]} : vector<8x64xf32> to vector<8x32xf32>
    %56 = arith.truncf %55 : vector<8x32xf32> to vector<8x32xbf16>
    %c0_15 = arith.constant 0 : index
    %c0_16 = arith.constant 0 : index
    %c0_17 = arith.constant 0 : index
    %57 = vector.load %arg7[%c0_15, %c0_16, %c0_17] : memref<1x8x32xbf16, #tpu.memory_space<vmem>>, vector<1x8x32xbf16>
    %58 = vector.shape_cast %57 : vector<1x8x32xbf16> to vector<8x32xbf16>
    %59 = vector.shape_cast %56 : vector<8x32xbf16> to vector<1x8x32xbf16>
    tpu.vector_store %arg7[%c0_15, %c0_16, %c0_17], %59 {strides = array<i32>} : memref<1x8x32xbf16, #tpu.memory_space<vmem>>, vector<1x8x32xbf16>,
    %60 = vector.extract_strided_slice %14 {offsets = [0, 64], sizes = [8, 32], strides = [1, 1]} : vector<8x96xf32> to vector<8x32xf32>
    %61 = arith.truncf %60 : vector<8x32xf32> to vector<8x32xbf16>
    %c0_18 = arith.constant 0 : index
    %c0_19 = arith.constant 0 : index
    %c0_20 = arith.constant 0 : index
    %62 = vector.load %arg8[%c0_18, %c0_19, %c0_20] : memref<1x8x32xbf16, #tpu.memory_space<vmem>>, vector<1x8x32xbf16>
    %63 = vector.shape_cast %62 : vector<1x8x32xbf16> to vector<8x32xbf16>
    %64 = vector.shape_cast %61 : vector<8x32xbf16> to vector<1x8x32xbf16>
    tpu.vector_store %arg8[%c0_18, %c0_19, %c0_20], %64 {strides = array<i32>} : memref<1x8x32xbf16, #tpu.memory_space<vmem>>, vector<1x8x32xbf16>,
    return
  }
  func.func @transform_0(%arg0: i32, %arg1: i32) -> (i32, i32, i32) {
    %c0_i32 = arith.constant 0 : i32
    %c0_i32_0 = arith.constant 0 : i32
    return %arg0, %arg1, %c0_i32 : i32, i32, i32
  }
  func.func @transform_1(%arg0: i32, %arg1: i32) -> (i32, i32) {
    %c0_i32 = arith.constant 0 : i32
    %c0_i32_0 = arith.constant 0 : i32
    return %arg1, %c0_i32 : i32, i32
  }
  func.func @transform_2(%arg0: i32, %arg1: i32) -> (i32, i32) {
    %c0_i32 = arith.constant 0 : i32
    %c0_i32_0 = arith.constant 0 : i32
    return %arg1, %c0_i32 : i32, i32
  }
  func.func @transform_3(%arg0: i32, %arg1: i32) -> (i32, i32) {
    %c0_i32 = arith.constant 0 : i32
    %c0_i32_0 = arith.constant 0 : i32
    %c0_i32_1 = arith.constant 0 : i32
    return %c0_i32, %c0_i32_0 : i32, i32
  }
  func.func @transform_4(%arg0: i32, %arg1: i32) -> (i32, i32, i32) {
    %c0_i32 = arith.constant 0 : i32
    %c0_i32_0 = arith.constant 0 : i32
    return %arg0, %arg1, %c0_i32 : i32, i32, i32
  }
  func.func @transform_5(%arg0: i32, %arg1: i32) -> (i32, i32, i32) {
    %c0_i32 = arith.constant 0 : i32
    %c0_i32_0 = arith.constant 0 : i32
    return %arg0, %arg1, %c0_i32 : i32, i32, i32
  }
  func.func @transform_6(%arg0: i32, %arg1: i32) -> (i32, i32, i32) {
    %c0_i32 = arith.constant 0 : i32
    %c0_i32_0 = arith.constant 0 : i32
    return %arg0, %arg1, %c0_i32 : i32, i32, i32
  }
}

</mosaic_0001>

<bundles_post_ra>
// kernel: tpu_custom_call.1
= control target key start
LH: loop header
LB: loop body
LE: loop exit
PB: predicated region body
PF: predicated region fallthrough
CT: control target
= control target key end

     0   :  { %s1521_s0 = inlined_call_operand.hbm [shape: f32[2,8,32], index: 0, kind: input, shape index: {}]   ;;  %s1522_s1 = inlined_call_operand.hbm [shape: f32[8,8], index: 1, kind: input, shape index: {}]   ;;  %s1523_s2 = inlined_call_operand.hbm [shape: f32[8,8], index: 2, kind: input, shape index: {}]   ;;  %s1524_s3 = inlined_call_operand.hbm [shape: bf16[32,96], index: 3, kind: input, shape index: {}]   ;;  %s1525_s4 = inlined_call_operand.hbm [shape: bf16[2,8,32], index: 4, kind: output, shape index: {0}]   ;;  %s1526_s5 = inlined_call_operand.hbm [shape: bf16[2,8,32], index: 5, kind: output, shape index: {1}]   ;;  %s1527_s6 = inlined_call_operand.hbm [shape: bf16[2,8,32], index: 6, kind: output, shape index: {2}]  }
   0x1   :  { %1529 = sst [smem:[#allocation19_spill]] %s1521_s0 }
   0x2   :  { %1530 = sst [smem:[#allocation20_spill]] %s1522_s1 }
   0x3   :  { %1531 = sst [smem:[#allocation21_spill]] %s1523_s2 }
   0x4   :  { %1532 = sst [smem:[#allocation22_spill]] %s1524_s3 }
   0x5   :  { %12 = vsyncpa [#allocation3], 0 }
   0x6   :  { %14 = vsyncpa [#allocation3 + $0x1], 0 }
   0x7   :  { %15 = vsyncpa [#allocation6], 0 }
   0x8   :  { %16 = vsyncpa [#allocation9], 0 }
   0x9   :  { %17 = vsyncpa [#allocation4], 0 }
   0xa   :  { %19 = vsyncpa [#allocation4 + $0x1], 0 }
   0xb   :  { %20 = vsyncpa [#allocation12], 0 }
   0xc   :  { %22 = vsyncpa [#allocation12 + $0x1], 0  ;;  %s1259_s21 = smov 0   ;;  %s1261_s22 = smov 0  }
   0xd   :  { %s1263_s23 = smov 0   ;;  %s1265_s24 = smov 0  }
   0xe   :  { %s1267_s25 = smov 0   ;;  %s1269_s26 = smov 0  }
   0xf LB: > { %s1290_s27 = sadd.s32 4294967295, %s1205_s26   ;;  %s1528_s28 = sadd.s32 4294967294, %s1205_s26   ;;  %s1205_s26 = sphi %s1269_s26, %s28_s26   ;;  %s1201_s25 = sphi %s1267_s25, %s1548_s25   ;;  %s1197_s24 = sphi %s1265_s24, %s1547_s24   ;;  %s1193_s23 = sphi %s1263_s23, %s1546_s23   ;;  %s1189_s22 = sphi %s1261_s22, %s1545_s22   ;;  %s1185_s21 = sphi %s1259_s21, %s1544_s21  }
  0x10   : > { %p62_p0 = scmp.ne.s32.totalorder %s1189_s22, %s1185_s21  ;;  %p63_p1 = scmp.eq.s32.totalorder %s1290_s27, 0 }
  0x11   : > { %p161_p2 = scmp.eq.s32.totalorder %s1290_s27, 1  ;;  %p167_p3 = scmp.eq.s32.totalorder %s1528_s28, 1 }
  0x12   : > { %p1301_p4 = por %p63_p1, %p62_p0  ;;  %p780_p5 = scmp.ge.s32.totalorder %s1205_s26, 1 }
  0x13   : > { %p1306_p6 = por %p167_p3, %p62_p0  ;;  %p230_p7 = scmp.lt.s32.totalorder %s1205_s26, 3 }
  0x14   : > { %s1535_s1 = sld [smem:[#allocation20_spill]]  ;;  %p784_p9 = scmp.ge.s32.totalorder %s1205_s26, 2 }
  0x15   : > { %p1314_p8 = pnand %p780_p5, %p230_p7  ;;  %s1207_s11 = smov [#allocation5]  }
  0x16   : > { %s246_s12 = sshll.u32 %s1207_s11, 4  ;;  %s1537_s2 = sld [smem:[#allocation21_spill]]  ;;  %s247_s12 = int_to_ptr.vmem [resolvable:$true] %s246_s12 }
  0x17   : > { %p834_p10 = pneg %p1314_p8  ;;  %s1539_s3 = sld [smem:[#allocation22_spill]] }
  0x18   : > { %s1208_s20 = smov [#allocation7]   ;;  %s1209_s8 = smov [#allocation8]  }
  0x19   : > { %p1326_p11 = pnand %p834_p10, %p63_p1  ;;  %s260_s7 = sshll.u32 %s1208_s20, 4  ;;  %s261_s7 = int_to_ptr.vmem [resolvable:$true] %s260_s7 }
  0x1a   : > { %s244_s9 = sshll.u32 %s1535_s1, 4  ;;  %s271_s11 = sshll.u32 %s1209_s8, 4  ;;  %s245_s9 = int_to_ptr.hbm [resolvable:$true] %s244_s9  ;;  %s272_s11 = int_to_ptr.vmem [resolvable:$true] %s271_s11 }
  0x1b   : > { %837 = dma.hbm_to_vmem [thread:$0]  (!%p1326_p11), %s245_s9, 128, %s247_s12, [#allocation6]  }
  0x1c   : > { %s258_s15 = sshll.u32 %s1537_s2, 4  ;;  %s1210_s13 = smov 64   ;;  %s259_s15 = int_to_ptr.hbm [resolvable:$true] %s258_s15 }
  0x1d   : > { %s269_s19 = sshll.u32 %s1539_s3, 4  ;;  %s1211_s14 = smov 4   ;;  %s270_s19 = int_to_ptr.hbm [resolvable:$true] %s269_s19 }
  0x1e   : > { %840 = dma.hbm_to_vmem [thread:$0]  (!%p1326_p11), %s259_s15, 128, %s261_s7, [#allocation6]  }
  0x1f   : > { %843 = dma.hbm_to_vmem [thread:$0]  (!%p1326_p11), %s270_s19, 256, %s272_s11, [#allocation9], %s1210_s13, %s1210_s13, %s1211_s14  }
  0x20   : > { %s49_s17 = sadd.s32 1, %s1193_s23  ;;  %s40_s18 = sadd.s32 1, %s1201_s25 }
  0x21   : > { %p56_p12 = scmp.ne.s32.totalorder %s1193_s23, %s1189_s22  ;;  %p42_p13 = scmp.ge.s32.totalorder %s40_s18, 2 }
  0x22   : > { %p57_p0 = scmp.eq.s32.totalorder %s1205_s26, 0  ;;  %p861_p5 = scmp.lt.s32.totalorder %s1205_s26, 2 }
  0x23   : > { %p1346_p3 = por %p161_p2, %p56_p12  ;;  %s1550_s18 = smov (%p42_p13, %s40_s18), 0 }
  0x24   : > { %p1353_p7 = por %p57_p0, %p56_p12  ;;  %s285_s15 = sand.u32 1, %s1193_s23  }
  0x25   : > { %s44_s16 = ssub.s32 %s1201_s25, %s1550_s18  ;;  %s785_s19 = sshll.u32 %s285_s15, 3 }
  0x26   : > { %p47_p10 = scmp.eq.s32.totalorder %s44_s16, 0  ;;  %s786_s20 = sshll.u32 %s1201_s25, 3 }
  0x27   : > { %s1542_s0 = sld [smem:[#allocation19_spill]]  ;;  %s289_s14 = scalar_lea.vmem [#allocation2], %s785_s19 }
  0x28   : > { %s1362_s7 = scalar_select %p47_p10, %s1193_s23, %s49_s17  }
  0x29   : > { %s298_s28 = sshll.u32 %s289_s14, 4  ;;  %p845_p2 = pnand %p861_p5, %p1353_p7  ;;  %s299_s28 = int_to_ptr.vmem [resolvable:$true] %s298_s28 }
  0x2a   : > { %s286_s2 = scalar_lea.sflag [#allocation3], %s285_s15  ;;  %s1374_s17 = sand.u32 (!%p1314_p8), 1, %s1189_s22  }
  0x2b   : > { %307 = sbr.rel (%p1314_p8) target bundleno = 594 (0x252), region = 36  ;;  %s788_s16 = sshll.u32 (!%p1314_p8), %s1374_s17, 3 }
  0x2c   : > { %s310_s19 = scalar_lea.sflag (!%p1314_p8), [#allocation3], %s1374_s17 }
  0x2d   : > { %s294_s13 = scalar_lea.hbm %s1542_s0, %s786_s20  ;;  %s313_s20 = scalar_lea.vmem (!%p1314_p8), [#allocation2], %s788_s16 }
  0x2e   : > { %s296_s1 = sshll.u32 %s294_s13, 4  ;;  %s297_s1 = int_to_ptr.hbm [resolvable:$true] %s296_s1 }
  0x2f   : > { %847 = dma.hbm_to_vmem [thread:$0]  (!%p845_p2), %s297_s1, 128, %s299_s28, %s286_s2  }
  0x30   : > { %1164 = dma.done.wait (%p1301_p4), %s310_s19, 128  }
  0x31   : > { %1166 = vsyncadd (%p1301_p4), %s310_s19, 4294967168 }
  0x32   : > { %1168 = dma.done.wait (%p63_p1), [#allocation6], 256  }
  0x33   : > { %1170 = vsyncadd (%p63_p1), [#allocation6], 4294967040 }
  0x34   : > { %1172 = dma.done.wait (%p63_p1), [#allocation9], 256  }
  0x35   : > { %1174 = vsyncadd (%p63_p1), [#allocation9], 4294967040  ;;  %v369_v0 = vld [vmem:[%s313_s20] sm:$0xff]  ;;  %vm371_vm0 = vcmask 261120   ;;  %v1212_v3 = vmov 32.0   ;;  %v1391_v11 = vld [vmem:[#allocation7] sm:$0xff] }
  0x36   : > { %v370_v1 = vmul.f32 %v369_v0, %v369_v0  ;;  %931 = vrcp.f32 %v1212_v3  ;;  %v813_v7 = vld [vmem:[#allocation8 + $0x8] sm:$0xff]  ;;  %v812_v8 = vld [vmem:[#allocation8] sm:$0xff]  ;;  %v464_v12 = vld [vmem:[#allocation5] sm:$0xff]  ;;  %s1213_s1 = smov 8   ;;  %s1214_s2 = smov 32   ;;  %vm437_vm5 = vcmask 64512  }
  0x37   : > { %421 = vmatpush.bf16.msra.mxu0 %v813_v7  ;;  %496 = vrot.lane.b32.xlu2 %v1391_v11, %s1213_s1  ;;  %s1215_s28 = smov 16   ;;  %s1216_s29 = smov 24   ;;  %vm441_vm6 = vcmask 130048   ;;  %vm445_vm7 = vcmask 195584   ;;  %vm529_vm8 = vcmask 257024   ;;  %vm435_vm9 = vcmask 31744  }
  0x38   : > { %v372_v2 = vsel %vm371_vm0, %v370_v1, 0.0  ;;  %466 = vrot.lane.b32.xlu1 %v464_v12, %s1213_s1  ;;  %s1217_s10 = smov 40   ;;  %s1218_s12 = smov 56   ;;  %vm439_vm10 = vcmask 97280   ;;  %vm443_vm11 = vcmask 162816   ;;  %vm447_vm12 = vcmask 228352  }
  0x39   : > { %373 = vadd.xlane.f32.xlu0 %v372_v2  ;;  %s1219_s15 = smov 4   ;;  %s1220_s8 = smov 124   ;;  %vm450_vm13 = vcmask 293888   ;;  %vm454_vm14 = vcmask 359424   ;;  %vm452_vm15 = vcmask 326656  }
  0x3a   : > { %s1221_s11 = smov 64   ;;  %s1222_s13 = smov 48  }
  0x3b   : > { %422 = vmatpush.bf16.msra.mxu0 %v812_v8  ;;  %s1411_s14 = sshll.u32 %s1374_s17, 2  ;;  %s1431_s19 = sshll.u32 %s1197_s24, 2 }
  0x3c   : > { %v932_v4 = vpop.eup %931  ;;  %s367_s16 = scalar_lea.vmem [#allocation13], %s1411_s14  ;;  %s1223_s24 = smov 96  }
  0x3d   : > { %v376_v5 = vmul.f32 32.0, %v932_v4  ;;  %vm380_vm1 = vweird.f32 %v932_v4  ;;  %s1075_s20 = scalar_lea.hbm %s1525_s4, 8 }
  0x3f   : > { %v377_v6 = vsub.f32 1.0, %v376_v5  ;;  %469 = vrot.lane.b32.xlu2 %v464_v12, %s1215_s28 }
  0x40   : > { %499 = vrot.lane.b32.xlu1 %v1391_v11, %s1215_s28  ;;  %s353_s28 = scalar_lea.vmem [#allocation10], %s1411_s14 }
  0x41   : > { %v378_v9 = vmul.f32 %v932_v4, %v377_v6 }
  0x43   : > { %v379_v10 = vadd.f32 %v932_v4, %v378_v9 }
  0x45   : > { %v381_v13 = vsel %vm380_vm1, %v932_v4, %v379_v10  ;;  %vm456_vm1 = vcmask 392192  }
  0x47   : > { %472 = vrot.lane.b32.xlu2 %v464_v12, %s1216_s29 }
  0x48   : > { %502 = vrot.lane.b32.xlu1 %v1391_v11, %s1216_s29  ;;  %s567_s29 = sshll.u32 %s353_s28, 4  ;;  %s568_s29 = int_to_ptr.vmem [resolvable:$true] %s567_s29 }
  0x4d   : > { %505 = vrot.lane.b32.xlu0 %v1391_v11, %s1214_s2 }
  0x4f   : > { %475 = vrot.lane.b32.xlu2 %v464_v12, %s1214_s2  ;;  %s565_s2 = scalar_lea.hbm %s1525_s4, %s1431_s19 }
  0x57   : > { %508 = vrot.lane.b32.xlu2 %v1391_v11, %s1217_s10 }
  0x5f   : > { %484 = vrot.lane.b32.xlu2 %v464_v12, %s1218_s12 }
  0x91   : > { %v497_v29 = vpop.permute.xlu2 %496 }
  0x92   : > { %v517_v47 = vsel %vm437_vm5, %v1391_v11, %v497_v29 }
  0x99   : > { %v470_v30 = vpop.permute.xlu2 %469 }
  0xa1   : > { %v473_v31 = vpop.permute.xlu2 %472 }
  0xa9   : > { %v476_v36 = vpop.permute.xlu2 %475 }
  0xaa   : > { %v467_v32 = vpop.permute.xlu1 %466 }
  0xab   : > { %v487_v33 = vsel %vm437_vm5, %v464_v12, %v467_v32 }
  0xac   : > { %v374_v14 = vpop.xlane.xlu0 %373  ;;  %v488_v34 = vsel %vm441_vm6, %v487_v33, %v470_v30 }
  0xad   : > { %v382_v15 = vmul.f32 %v381_v13, %v374_v14  ;;  %v489_v35 = vsel %vm445_vm7, %v488_v34, %v473_v31 }
  0xae   : > { %v490_v58 = vsel %vm371_vm0, %v489_v35, %v476_v36 }
  0xaf   : > { %v383_v16 = vadd.f32 1e-06, %v382_v15 }
  0xb1   : > { %933 = vrsqrt.f32 %v383_v16  ;;  %vm390_vm3 = vweird.f32 %v383_v16  ;;  %v509_v37 = vpop.permute.xlu2 %508 }
  0xb2   : > { %v500_v40 = vpop.permute.xlu1 %499 }
  0xb3   : > { %v518_v51 = vsel %vm441_vm6, %v517_v47, %v500_v40 }
  0xb7   : > { %v934_v17 = vpop.eup %933 }
  0xb8   : > { %v385_v18 = vmul.f32 %v934_v17, %v383_v16  ;;  %vm391_vm2 = vweird.f32 %v934_v17 }
  0xb9   : > { %vm392_vm4 = vmor %vm390_vm3, %vm391_vm2  ;;  %v485_v38 = vpop.permute.xlu2 %484  ;;  %vm458_vm2 = vcmask 424960   ;;  %vm460_vm3 = vcmask 457728  }
  0xba   : > { %v386_v19 = vmul.f32 %v934_v17, %v385_v18  ;;  %v503_v41 = vpop.permute.xlu1 %502 }
  0xbb   : > { %v519_v57 = vsel %vm445_vm7, %v518_v51, %v503_v41 }
  0xbc   : > { %v387_v20 = vmul.f32 0.5, %v386_v19 }
  0xbe   : > { %v388_v21 = vsub.f32 1.5, %v387_v20 }
  0xbf   : > { %v506_v42 = vpop.permute.xlu0 %505 }
  0xc0   : > { %v389_v22 = vmul.f32 %v934_v17, %v388_v21 }
  0xc2   : > { %v393_v23 = vsel %vm392_vm4, %v934_v17, %v389_v22  ;;  %vm462_vm4 = vcmask 490496  }
  0xc3   : > { %v394_v24 = vmul.f32 %v393_v23, %v369_v0  ;;  %v520_v0 = vsel %vm371_vm0, %v519_v57, %v506_v42 }
  0xc4   : > { %v521_v6 = vsel %vm452_vm15, %v520_v0, %v509_v37 }
  0xc5   : > { %v395_v25 = vpack.c.bf16 %v394_v24, %v394_v24 }
  0xc7   : > { %803 = vmatmul.msk.bf16.vlgmr.msra.gmra.mxu0 %vm371_vm0, %v395_v25 }
 0x144   : > { %v1399_v26 = vpop.f32.mrf.mxu0 }
 0x145   : > { %432 = vrot.lane.b32.xlu1 %v1399_v26, %s1219_s15  ;;  %429 = vrot.lane.b32.xlu0 %v1399_v26, %s1220_s8  ;;  %v537_v27 = vpack.c.bf16 %v1399_v26, %v1399_v26 }
 0x147   : > { %539 = vrot.lane.b32.xlu2 %v537_v27, %s1221_s11 }
 0x14c   : > { %v426_v28 = vpop.f32.mrf.mxu0 }
 0x14d   : > { %478 = vrot.lane.b32.xlu1 %v464_v12, %s1217_s10  ;;  %481 = vrot.lane.b32.xlu0 %v464_v12, %s1222_s13  ;;  %s569_s10 = sshll.u32 %s565_s2, 4  ;;  %s570_s10 = int_to_ptr.hbm [resolvable:$true] %s569_s10 }
 0x14e   : > { %s1069_s15 = sshra.s32 %s570_s10, 4  ;;  %s1070_s15 = int_to_ptr.hbm [resolvable:$true] %s1069_s15 }
 0x14f   : > { %s1071_s8 = scalar_lea.hbm %s1070_s15, 4  ;;  %p1076_p11 = scmp.lt.s32.totalorder %s1070_s15, %s1525_s4 }
 0x150   : > { %p1072_p1 = scmp.ne.s32.totalorder %s1070_s15, %s1071_s8  ;;  %p1077_p12 = scmp.lt.s32.totalorder %s1075_s20, %s1071_s8 }
 0x152   : > { %p1073_p4 = pnand %p1072_p1, %p1346_p3  ;;  %p1078_p13 = por %p1077_p12, %p1076_p11 }
 0x154   : > { %p1074_p8 = pneg %p1073_p4 }
 0x155   : > { %511 = vrot.lane.b32.xlu1 %v1391_v11, %s1222_s13  ;;  %514 = vrot.lane.b32.xlu0 %v1391_v11, %s1218_s12  ;;  %s544_s12 = scalar_lea.sflag [#allocation4], %s1374_s17 }
 0x156   : > { %p1079_p0 = pnand %p1078_p13, %p1074_p8 }
 0x1a1   : > { %v540_v39 = vpop.permute.xlu2 %539 }
 0x1a2   : > { %542 = vst.msk [vmem:[%s367_s16] sm:$0xf] %vm529_vm8, %v540_v39 }
 0x1b7   : > { %v433_v43 = vpop.permute.xlu1 %432  ;;  %v430_v44 = vpop.permute.xlu0 %429 }
 0x1b8   : > { %v436_v45 = vsel %vm435_vm9, %v430_v44, %v433_v43 }
 0x1b9   : > { %v438_v46 = vsel %vm437_vm5, %v436_v45, %v430_v44 }
 0x1ba   : > { %v440_v48 = vsel %vm439_vm10, %v438_v46, %v433_v43 }
 0x1bb   : > { %v442_v49 = vsel %vm441_vm6, %v440_v48, %v430_v44 }
 0x1bc   : > { %v444_v50 = vsel %vm443_vm11, %v442_v49, %v433_v43 }
 0x1bd   : > { %v446_v52 = vsel %vm445_vm7, %v444_v50, %v430_v44 }
 0x1be   : > { %v448_v53 = vsel %vm447_vm12, %v446_v52, %v433_v43 }
 0x1bf   : > { %v479_v54 = vpop.permute.xlu1 %478  ;;  %v449_v55 = vsel %vm371_vm0, %v448_v53, %v430_v44  ;;  %v482_v56 = vpop.permute.xlu0 %481 }
 0x1c0   : > { %v451_v59 = vsel %vm450_vm13, %v449_v55, %v433_v43  ;;  %v491_v61 = vsel %vm452_vm15, %v490_v58, %v479_v54 }
 0x1c1   : > { %v453_v60 = vsel %vm452_vm15, %v451_v59, %v430_v44  ;;  %v492_v1 = vsel %vm456_vm1, %v491_v61, %v482_v56 }
 0x1c2   : > { %v455_v62 = vsel %vm454_vm14, %v453_v60, %v433_v43  ;;  %v493_v4 = vsel %vm460_vm3, %v492_v1, %v485_v38 }
 0x1c3   : > { %v457_v63 = vsel %vm456_vm1, %v455_v62, %v430_v44  ;;  %v524_v11 = vmul.f32 %v493_v4, %v1399_v26 }
 0x1c4   : > { %v459_v2 = vsel %vm458_vm2, %v457_v63, %v433_v43 }
 0x1c5   : > { %v461_v3 = vsel %vm460_vm3, %v459_v2, %v430_v44 }
 0x1c6   : > { %v463_v9 = vsel %vm462_vm4, %v461_v3, %v433_v43 }
 0x1c7   : > { %v512_v5 = vpop.permute.xlu1 %511  ;;  %v515_v7 = vpop.permute.xlu0 %514 }
 0x1c8   : > { %v522_v8 = vsel %vm456_vm1, %v521_v6, %v512_v5 }
 0x1c9   : > { %v523_v10 = vsel %vm460_vm3, %v522_v8, %v515_v7 }
 0x1ca   : > { %v525_v12 = vmul.f32 %v523_v10, %v463_v9 }
 0x1cc   : > { %v526_v13 = vadd.f32 %v525_v12, %v524_v11 }
 0x1ce   : > { %v527_v14 = vmul.f32 0.35355338, %v526_v13  ;;  %v531_v15 = vpack.c.bf16 %v526_v13, %v526_v13 }
 0x1d0   : > { %v528_v16 = vpack.c.bf16 %v527_v14, %v527_v14  ;;  %533 = vrot.lane.b32.xlu1 %v531_v15, %s1223_s24 }
 0x1d2   : > { %530 = vst.msk [vmem:[%s353_s28] sm:$0xf] %vm529_vm8, %v528_v16 }
 0x1d3   : > { %1082 = shalt.err (!%p1079_p0)
}
 0x1d4   : > { %828 = dma.vmem_to_hbm [thread:$0]  (%p1346_p3), %s568_s29, 64, %s570_s10, %s544_s12  }
 0x1d5   : > { %s580_s24 = scalar_lea.hbm %s1526_s5, %s1431_s19  ;;  %s595_s15 = scalar_lea.hbm %s1527_s6, %s1431_s19 }
 0x1d6   : > { %s548_s8 = sand.u32 1, %s1290_s27   ;;  %s360_s20 = scalar_lea.vmem [#allocation11], %s1411_s14 }
 0x1d7   : > { %s582_s1 = sshll.u32 %s360_s20, 4  ;;  %s584_s2 = sshll.u32 %s580_s24, 4  ;;  %s583_s1 = int_to_ptr.vmem [resolvable:$true] %s582_s1  ;;  %s585_s2 = int_to_ptr.hbm [resolvable:$true] %s584_s2 }
 0x1d8   : > { %s1463_s0 = sshll.u32 %s367_s16, 4  ;;  %s1465_s3 = sshll.u32 %s595_s15, 4  ;;  %s598_s0 = int_to_ptr.vmem [resolvable:$true] %s1463_s0  ;;  %s600_s3 = int_to_ptr.hbm [resolvable:$true] %s1465_s3 }
 0x1d9   : > { %s549_s19 = scalar_lea.sflag [#allocation12], %s548_s8  ;;  %s1097_s27 = sshra.s32 %s585_s2, 4  ;;  %s1098_s27 = int_to_ptr.hbm [resolvable:$true] %s1097_s27 }
 0x1da   : > { %s1099_s29 = scalar_lea.hbm %s1098_s27, 4  ;;  %s1103_s10 = scalar_lea.hbm %s1526_s5, 8 }
 0x1db   : > { %p1100_p5 = scmp.ne.s32.totalorder %s1098_s27, %s1099_s29  ;;  %p1104_p2 = scmp.lt.s32.totalorder %s1098_s27, %s1526_s5 }
 0x1dc   : > { %p1105_p1 = scmp.lt.s32.totalorder %s1103_s10, %s1099_s29 }
 0x1dd   : > { %p1101_p7 = pnand %p1100_p5, %p1346_p3 }
 0x1de   : > { %p1106_p4 = por %p1105_p1, %p1104_p2 }
 0x1df   : > { %p1102_p10 = pneg %p1101_p7 }
 0x1e1   : > { %p1107_p8 = pnand %p1106_p4, %p1102_p10 }
 0x242   : > { %v534_v17 = vpop.permute.xlu1 %533 }
 0x243   : > { %536 = vst.msk [vmem:[%s360_s20] sm:$0xf] %vm529_vm8, %v534_v17 }
 0x244   : > { %1110 = shalt.err (!%p1107_p8)
}
 0x245   : > { %829 = dma.vmem_to_hbm [thread:$0]  (%p1346_p3), %s583_s1, 64, %s585_s2, %s549_s19  }
 0x246   : > { %s1125_s28 = sshra.s32 %s600_s3, 4  ;;  %s1131_s15 = scalar_lea.hbm %s1527_s6, 8  ;;  %s1126_s28 = int_to_ptr.hbm [resolvable:$true] %s1125_s28 }
 0x247   : > { %s1127_s24 = scalar_lea.hbm %s1126_s28, 4  ;;  %p1132_p0 = scmp.lt.s32.totalorder %s1126_s28, %s1527_s6 }
 0x248   : > { %p1128_p11 = scmp.ne.s32.totalorder %s1126_s28, %s1127_s24  ;;  %p1133_p5 = scmp.lt.s32.totalorder %s1131_s15, %s1127_s24 }
 0x24a   : > { %p1129_p12 = pnand %p1128_p11, %p1346_p3  ;;  %p1134_p7 = por %p1133_p5, %p1132_p0 }
 0x24c   : > { %p1130_p13 = pneg %p1129_p12 }
 0x24e   : > { %p1135_p10 = pnand %p1134_p7, %p1130_p13 }
 0x250   : > { %1138 = shalt.err (!%p1135_p10)
}
 0x251   : > { %830 = dma.vmem_to_hbm [thread:$0]  (%p1346_p3), %s598_s0, 64, %s600_s3, %s549_s19  }
 0x252 PF: > { %s611_s1 = sand.u32 1, %s1185_s21   ;;  %p849_p2 = pnand %p784_p9, %p1306_p6 }
 0x253   : > { %s612_s2 = scalar_lea.sflag [#allocation4], %s611_s1 }
 0x254   : > { %p850_p1 = pneg %p849_p2 }
 0x256   : > { %1176 = dma.done.wait (%p850_p1), %s612_s2, 64  }
 0x257   : > { %1178 = vsyncadd (%p850_p1), %s612_s2, 4294967232  ;;  %s1543_s27 = sadd.s32 4294967294, %s1205_s26  }
 0x258   : > { %s621_s9 = sand.u32 1, %s1543_s27  }
 0x259   : > { %s622_s29 = scalar_lea.sflag [#allocation12], %s621_s9 }
 0x25a   : > { %1180 = dma.done.wait (%p850_p1), %s622_s29, 128  }
 0x25b   : > { %1182 = vsyncadd (%p850_p1), %s622_s29, 4294967168  ;;  %s28_s26 = sadd.s32 1, %s1205_s26   ;;  %s1544_s21 = smov %s1189_s22 }
 0x25c   : > { %p25_p3 = scmp.ge.s32.totalorder %s28_s26, 4   ;;  %s1545_s22 = smov %s1193_s23 }
 0x25d   : > { %s1546_s23 = smov %s1362_s7  ;;  %s1547_s24 = smov %s1201_s25 }
 0x25e   : > { %s1548_s25 = smov %s1550_s18  ;;  %27 = sbr.rel (!%p25_p3) target bundleno = 15 (0xf), region = 127 }
 0x263   :  { %638 = vsyncpa [#allocation3], 1 }
 0x264   :  { %640 = vsyncpa [#allocation3 + $0x1], 1 }
 0x265   :  { %641 = vsyncpa [#allocation6], 1 }
 0x266   :  { %642 = vsyncpa [#allocation9], 1 }
 0x267   :  { %643 = vsyncpa [#allocation4], 1 }
 0x268   :  { %645 = vsyncpa [#allocation4 + $0x1], 1 }
 0x269   :  { %646 = vsyncpa [#allocation12], 1 }
 0x26a   :  { %648 = vsyncpa [#allocation12 + $0x1], 1 }

</bundles_post_ra>
